<compile_context>
chip_gen: v5e
topology: v5e:2x2
jax: 0.10.0
libtpu: 0.0.40
codegen_flags: <defaults>
</compile_context>

<pallas_src>
import jax
import jax.numpy as jnp
from jax.experimental import pallas as pl
from jax.experimental.pallas import tpu as pltpu


def _round_up(a, b):
    return ((a + b - 1) // b) * b


def _pick_tn(d_pad, tn_cap):
    """Untiled N when it fits; otherwise the largest 128-multiple tile dividing D_pad."""
    if d_pad <= tn_cap:
        return d_pad
    for t in (2048, 1024, 512, 256, 128):
        if t <= tn_cap and d_pad % t == 0:
            return t
    return 128


def _pick_tm(m, sub, tm_cap):
    """Choose the M tile.  Prefer exact, sublane-aligned divisors of M (no padding ->
    no output slice copy), as large as possible under tm_cap; keep >=2 blocks for
    megacore when M is large.  Fall back to minimal padding otherwise."""
    cap = max(sub, (min(tm_cap, m) // sub) * sub)
    if m % sub == 0:
        best = None
        d = cap
        while d >= sub:
            if m % d == 0:
                best = d
                break
            d -= sub
        if best is not None and (m <= tm_cap or best >= 256):
            if best == m and m >= 1024:
                # Split into >=2 aligned blocks so both v7x TensorCores get work.
                d = (m // 2) // sub * sub
                while d >= 256:
                    if m % d == 0:
                        best = d
                        break
                    d -= sub
            return best, m
    # Fallback: pad M, picking tm to minimize the padded rows.
    n_blk = -(-m // cap)
    tm = min(cap, _round_up(-(-m // n_blk), sub))
    return tm, _round_up(m, tm)


def fused_tap_matmul_kernel(x_ref, w_ref, o_ref):
    # x_ref: (TM, 3C), w_ref: (3C, TN), o_ref: (TM, TN)
    o_ref[...] = jnp.dot(
        x_ref[...], w_ref[...], preferred_element_type=jnp.float32
    ).astype(o_ref.dtype)


def prepare_weights(weight):
    """Hoisted param-prep (do once, not per forward call).

    weight: torch Conv1d layout [D, C, 3] -> fused (3C, D_pad) where row k*C + c
    multiplies x[(t + k - 1) mod L, c].  D is padded to a multiple of 128 only when
    needed (lane-dense output stores); when d_model % 128 == 0 no padding -> no
    output slice copy in the wrapper.
    """
    D, C, K = weight.shape
    assert K == 3
    w = jnp.transpose(weight, (2, 1, 0)).reshape(3 * C, D)  # (3C, D)
    if D % 128 != 0:
        w = jnp.pad(w, ((0, 0), (0, _round_up(D, 128) - D)))
    return w


def token_embedding2(x, w_cat, d_model, tm_cap=2048, tn_cap=2048):
    """x: [B, L, C]; w_cat: prepared (3C, D_pad) weights.  Returns [B, L, d_model]."""
    B, L, C = x.shape
    K3, D_pad = w_cat.shape
    assert K3 == 3 * C and D_pad >= d_model
    assert D_pad == d_model or D_pad % 128 == 0

    dtype = x.dtype
    itemsize = jnp.dtype(dtype).itemsize
    sub = max(8, 32 // itemsize)  # sublane packing: 8 (f32) / 16 (bf16) / 32 (int8)

    # Circular taps per batch BEFORE flattening:
    #   col block 0: x[(t-1) mod L], block 1: x[t], block 2: x[(t+1) mod L]
    M = B * L
    x_cat = jnp.concatenate(
        [jnp.roll(x, 1, axis=1), x, jnp.roll(x, -1, axis=1)], axis=-1
    ).reshape(M, 3 * C)

    # Lane-dense output width; untiled N when it fits.
    tn = _pick_tn(D_pad, tn_cap)

    # Keep the double-buffered output block comfortably inside VMEM on every gen
    # (v7x has only 64 MiB / TC): budget ~24 MiB for the out double buffer.
    out_budget = 24 * 1024 * 1024
    tm_vmem_cap = max(sub, (out_budget // (2 * tn * itemsize)) // sub * sub)
    tm, m_pad = _pick_tm(M, sub, min(tm_cap, tm_vmem_cap))
    if m_pad != M:
        x_cat = jnp.pad(x_cat, ((0, m_pad - M), (0, 0)))

    # N outer, M inner -> the weight block index is constant across the inner loop,
    # so its DMA is skipped after the first fetch.  n_blocks == 1 in the common case.
    grid = (D_pad // tn, m_pad // tm)

    out = pl.pallas_call(
        fused_tap_matmul_kernel,
        out_shape=jax.ShapeDtypeStruct((m_pad, D_pad), dtype),
        grid_spec=pltpu.PrefetchScalarGridSpec(
            num_scalar_prefetch=0,
            grid=grid,
            in_specs=[
                pl.BlockSpec((tm, 3 * C), lambda n, m: (m, 0)),
                pl.BlockSpec((3 * C, tn), lambda n, m: (0, n)),
            ],
            out_specs=pl.BlockSpec((tm, tn), lambda n, m: (m, n)),
        ),
        compiler_params=pltpu.CompilerParams(
            dimension_semantics=("parallel", "parallel"),
            vmem_limit_bytes=48 * 1024 * 1024,  # headroom below v7x's 64 MiB physical
            # Let XLA fuse the roll/concat producer into the kernel's x operand
            # instead of materializing x_cat in HBM (harmless no-op if declined).
            allow_input_fusion=[True, False],
        ),
        cost_estimate=pl.CostEstimate(
            flops=2 * m_pad * (3 * C) * D_pad,
            transcendentals=0,
            bytes_accessed=int(
                (m_pad * 3 * C + 3 * C * D_pad + m_pad * D_pad) * itemsize
            ),
        ),
    )(x_cat, w_cat)

    if m_pad != M or D_pad != d_model:
        out = out[:M, :d_model]
    return out.reshape(B, L, d_model)


def reference(x, weight):
    # Pure-JAX reference of the circular conv1d (bias=False), same layout.
    w = jnp.transpose(weight, (2, 1, 0))  # [3, C, D]
    out = jnp.zeros(x.shape[:2] + (weight.shape[0],), jnp.float32)
    for k in range(3):
        xs = jnp.roll(x, shift=1 - k, axis=1)  # x[(t + k - 1) mod L]
        out = out + jnp.einsum("blc,cd->bld", xs, w[k])
    return out.astype(x.dtype)


if __name__ == "__main__":
    B, L, C, D = 2, 8, 4, 32  # batch, seq, c_in, d_model
    key = jax.random.PRNGKey(0)
    kx, kw = jax.random.split(key)
    x = jax.random.normal(kx, (B, L, C), dtype=jnp.float32)

    # Deterministic kaiming_normal_(mode='fan_in', nonlinearity='leaky_relu') init.
    negative_slope = 0.01
    gain = (2.0 / (1.0 + negative_slope ** 2)) ** 0.5
    fan_in = C * 3
    std = gain / (fan_in ** 0.5)
    weight = std * jax.random.normal(kw, (D, C, 3), dtype=jnp.float32)  # torch [D, C, K]

    # TODO(synk): the PyTorch forward also does print('TokenEmbedding X'); side-effect only.
    w_cat = prepare_weights(weight)  # hoisted: done once at parameter-prep time
    fwd = jax.jit(lambda xx: token_embedding2(xx, w_cat, D))
    out = jax.block_until_ready(fwd(x))
    ref = reference(x, weight)
    assert out.shape == (B, L, D)
    assert jnp.allclose(out, ref, atol=1e-5, rtol=1e-5)
    print("KERNEL_OK")
</pallas_src>

<mosaic_0001>
module attributes {stable_mosaic.version = 11 : i64} {
  func.func @fused_tap_matmul_kernel(%arg0: i32, %arg1: i32, %arg2: memref<16x12xf32, #tpu.memory_space<vmem>>, %arg3: memref<12x128xf32, #tpu.memory_space<vmem>>, %arg4: memref<16x128xf32, #tpu.memory_space<vmem>>) attributes {dimension_semantics = [#tpu.dimension_semantics<parallel>, #tpu.dimension_semantics<parallel>], iteration_bounds = array<i64: 1, 1>, scalar_prefetch = 0 : i64, scratch_operands = 0 : i64, tpu.core_type = #tpu.core_type<tc>, window_params = [{transform_indices = @transform_0, window_bounds = array<i64: 16, 12>}, {transform_indices = @transform_1, window_bounds = array<i64: 12, 128>}, {transform_indices = @transform_2, window_bounds = array<i64: 16, 128>}]} {
    %c0 = arith.constant 0 : index
    %c0_0 = arith.constant 0 : index
    %0 = vector.load %arg2[%c0, %c0_0] : memref<16x12xf32, #tpu.memory_space<vmem>>, vector<16x12xf32>
    %c0_1 = arith.constant 0 : index
    %c0_2 = arith.constant 0 : index
    %1 = vector.load %arg3[%c0_1, %c0_2] : memref<12x128xf32, #tpu.memory_space<vmem>>, vector<12x128xf32>
    %cst = arith.constant dense<0.000000e+00> : vector<16x128xf32>
    %2 = tpu.matmul %0, %1, %cst {dimension_numbers = #tpu.dot_dimension_numbers<[1], [0], [0], [1], [0, 0, 1, 1], [], []>} : vector<16x12xf32>, vector<12x128xf32>, vector<16x128xf32> -> vector<16x128xf32>
    %c0_3 = arith.constant 0 : index
    %c0_4 = arith.constant 0 : index
    %3 = vector.load %arg4[%c0_3, %c0_4] : memref<16x128xf32, #tpu.memory_space<vmem>>, vector<16x128xf32>
    tpu.vector_store %arg4[%c0_3, %c0_4], %2 {strides = array<i32>} : memref<16x128xf32, #tpu.memory_space<vmem>>, vector<16x128xf32>,
    return
  }
  func.func @transform_0(%arg0: i32, %arg1: i32) -> (i32, i32) {
    %c0_i32 = arith.constant 0 : i32
    %c0_i32_0 = arith.constant 0 : i32
    return %arg1, %c0_i32 : i32, i32
  }
  func.func @transform_1(%arg0: i32, %arg1: i32) -> (i32, i32) {
    %c0_i32 = arith.constant 0 : i32
    %c0_i32_0 = arith.constant 0 : i32
    return %c0_i32, %arg0 : i32, i32
  }
  func.func @transform_2(%arg0: i32, %arg1: i32) -> (i32, i32) {
    %c0_i32 = arith.constant 0 : i32
    return %arg1, %arg0 : i32, i32
  }
}

</mosaic_0001>

<bundles_post_ra>
// kernel: _lambda_.2
= control target key start
LH: loop header
LB: loop body
LE: loop exit
PB: predicated region body
PF: predicated region fallthrough
CT: control target
= control target key end

     0   :  { %vm32_vm0 = vcmask 1043456   ;;  %vm25_vm1 = vcmask 97280   ;;  %s104_s0 = inlined_call_operand.vmem [shape: f32[12,128], index: 0, kind: input, shape index: {}]   ;;  %s105_s1 = inlined_call_operand.vmem [shape: f32[2,8,12], index: 1, kind: input, shape index: {}]   ;;  %s106_s2 = inlined_call_operand.vmem [shape: f32[16,128], index: 2, kind: output, shape index: {}]  }
   0x1   :  { %v24_v0 = vld [vmem:[%s104_s0 + $0x8] sm:$0xf]  ;;  %v23_v1 = vld [vmem:[%s104_s0] sm:$0xff] }
   0x2   :  { %66 = vmatpush.msk.msra.mxu0 %vm32_vm0, %v24_v0  ;;  %69 = vmatpush.msk.msra.mxu1 %vm32_vm0, %v24_v0  ;;  %v11_v2 = vld [vmem:[%s105_s1] sm:$0xff]  ;;  %v65_v3 = vld [vmem:[%s105_s1 + $0x8] sm:$0xff] }
   0x4   :  { %51 = vmatpush.msra.mxu0 %v23_v1  ;;  %70 = vmatpush.msra.mxu1 %v23_v1 }
   0x5   :  { %67 = vmatmul.msk.f32.vlgmr.msra.gmra.mxu0 %vm25_vm1, %v11_v2  ;;  %68 = vmatmul.msk.f32.vlgmr.msra.gmra.mxu1 %vm25_vm1, %v65_v3 }
  0x82   :  { %v53_v4 = vpop.f32.mrf.mxu0  ;;  %v56_v5 = vpop.f32.mrf.mxu1 }
  0x83   :  { %59 = vst [vmem:[%s106_s2] sm:$0xff] %v53_v4 }
  0x84   :  { %60 = vst [vmem:[%s106_s2 + $0x8] sm:$0xff] %v56_v5 }

</bundles_post_ra>
